<compile_context>
chip_gen: v5e
topology: v5e:2x2
jax: 0.10.0
libtpu: 0.0.40
codegen_flags: <defaults>
</compile_context>

<pallas_src>
import functools

import jax
import jax.numpy as jnp
from jax.experimental import pallas as pl
from jax.experimental.pallas import tpu as pltpu


def _nbeats_kernel(x_ref, w_in_ref, b_in_ref, w_hid_ref, b_hid_ref,
                   w_head_ref, b_head_ref, out_ref, *,
                   num_blocks, num_hidden_layers, seq_len, pred_len):
    """Full N-BEATS generic stack for one batch tile; carries stay in vregs."""
    cdt = w_in_ref.dtype                                   # compute dtype (bf16)
    resid = x_ref[...].astype(jnp.float32)                 # (TB, S)  f32 carry
    fcast = jnp.zeros((resid.shape[0], pred_len), jnp.float32)

    for blk in range(num_blocks):
        # First FC layer: seq_len -> hidden, ReLU.
        h = jnp.maximum(
            jnp.dot(resid.astype(cdt), w_in_ref[blk],
                    preferred_element_type=jnp.float32) + b_in_ref[blk], 0.0)

        # Remaining FC layers: hidden -> hidden, ReLU (per-layer ref loads).
        for l in range(num_hidden_layers):
            h = jnp.maximum(
                jnp.dot(h.astype(cdt), w_hid_ref[blk, l],
                        preferred_element_type=jnp.float32)
                + b_hid_ref[blk, l], 0.0)

        # Fused theta head: one matmul producing [backcast | forecast].
        theta = jnp.dot(h.astype(cdt), w_head_ref[blk],
                        preferred_element_type=jnp.float32) + b_head_ref[blk]

        # Doubly residual stacking.
        resid = resid - theta[:, :seq_len]
        fcast = fcast + theta[:, seq_len:]

    out_ref[...] = fcast.astype(out_ref.dtype)


def nbeats_forward(x_enc, packed):
    """x_enc: (B, seq_len, 1) float32 -> (B, pred_len, 1) float32."""
    w_in, b_in, w_hid, b_hid, w_head, b_head = packed
    num_blocks, seq_len, hidden = w_in.shape
    num_hidden_layers = w_hid.shape[1]
    pred_len = w_head.shape[-1] - seq_len
    B = x_enc.shape[0]

    if num_hidden_layers == 0:
        # Zero-sized dims may fail to lower; pass a dummy slab the kernel
        # statically never reads.
        w_hid = jnp.zeros((num_blocks, 1, hidden, hidden), w_in.dtype)
        b_hid = jnp.zeros((num_blocks, 1, 1, hidden), jnp.float32)
    nh = w_hid.shape[1]

    x = x_enc[..., 0].astype(jnp.float32)        # (B, S) — univariate series.

    # Batch tile: multiple of 8 sublanes, single tile for small B, 256 rows
    # per grid step for large B (grid axis is "parallel" -> megacore).
    Bp = max(8, ((B + 7) // 8) * 8)
    tb = Bp if Bp <= 256 else 256
    Bp = ((Bp + tb - 1) // tb) * tb
    if Bp != B:
        x = jnp.pad(x, ((0, Bp - B), (0, 0)))
    n_tiles = Bp // tb

    kernel = functools.partial(
        _nbeats_kernel,
        num_blocks=num_blocks, num_hidden_layers=nh,
        seq_len=seq_len, pred_len=pred_len)

    def full(arr):
        """Full-array VMEM block, constant block index (resident across grid)."""
        nd = arr.ndim
        return pl.BlockSpec(arr.shape, lambda i, _nd=nd: (0,) * _nd,
                            memory_space=pltpu.MemorySpace.VMEM)

    out = pl.pallas_call(
        kernel,
        out_shape=jax.ShapeDtypeStruct((Bp, pred_len), jnp.float32),
        grid=(n_tiles,),
        in_specs=[
            pl.BlockSpec((tb, seq_len), lambda i: (i, 0),
                         memory_space=pltpu.MemorySpace.VMEM),
            full(w_in), full(b_in), full(w_hid), full(b_hid),
            full(w_head), full(b_head),
        ],
        out_specs=pl.BlockSpec((tb, pred_len), lambda i: (i, 0),
                               memory_space=pltpu.MemorySpace.VMEM),
        compiler_params=pltpu.CompilerParams(
            dimension_semantics=("parallel",)),
    )(x, w_in, b_in, w_hid, b_hid, w_head, b_head)

    dec_out = out[:B, :, None]                   # (B, pred_len, 1)
    return dec_out[:, -pred_len:, :]             # mirror forward()'s final slice


def nbeats_reference(x_enc, packed):
    """Pure-JAX reference using the same packed (bf16) parameters."""
    w_in, b_in, w_hid, b_hid, w_head, b_head = packed
    num_blocks, seq_len, hidden = w_in.shape
    nh = w_hid.shape[1]
    pred_len = w_head.shape[-1] - seq_len
    cdt = w_in.dtype

    resid = x_enc[..., 0].astype(jnp.float32)
    fcast = jnp.zeros((x_enc.shape[0], pred_len), jnp.float32)
    for blk in range(num_blocks):
        h = jnp.maximum(
            jnp.dot(resid.astype(cdt), w_in[blk],
                    preferred_element_type=jnp.float32) + b_in[blk], 0.0)
        for l in range(nh):
            h = jnp.maximum(
                jnp.dot(h.astype(cdt), w_hid[blk, l],
                        preferred_element_type=jnp.float32) + b_hid[blk, l], 0.0)
        theta = jnp.dot(h.astype(cdt), w_head[blk],
                        preferred_element_type=jnp.float32) + b_head[blk]
        resid = resid - theta[:, :seq_len]
        fcast = fcast + theta[:, seq_len:]
    return fcast[:, :, None]


def init_params(key, num_blocks, num_layers, seq_len, pred_len, hidden):
    """Deterministic parameter init (torch Linear-style uniform fan-in), f32."""
    ks = jax.random.split(key, 8)

    def u(k, shape, fan_in):
        bound = 1.0 / jnp.sqrt(fan_in)
        return jax.random.uniform(k, shape, jnp.float32, -bound, bound)

    nh = num_layers - 1
    w_in = u(ks[0], (num_blocks, seq_len, hidden), seq_len)
    b_in = u(ks[1], (num_blocks, hidden), seq_len)
    w_hid = u(ks[2], (num_blocks, nh, hidden, hidden), hidden)
    b_hid = u(ks[3], (num_blocks, nh, hidden), hidden)
    w_back = u(ks[4], (num_blocks, hidden, seq_len), hidden)
    b_back = u(ks[5], (num_blocks, seq_len), hidden)
    w_fore = u(ks[6], (num_blocks, hidden, pred_len), hidden)
    b_fore = u(ks[7], (num_blocks, pred_len), hidden)
    return (w_in, b_in, w_hid, b_hid, w_back, b_back, w_fore, b_fore)


def pack_params(raw, dtype=jnp.bfloat16):
    """Cast weights to bf16, fuse back/fore heads, keep f32 biases (2D rows)."""
    (w_in, b_in, w_hid, b_hid, w_back, b_back, w_fore, b_fore) = raw
    w_head = jnp.concatenate([w_back, w_fore], axis=-1).astype(dtype)
    b_head = jnp.concatenate([b_back, b_fore], axis=-1)[:, None, :]      # (NB,1,S+P)
    return (w_in.astype(dtype),
            b_in[:, None, :],                                            # (NB,1,H)
            w_hid.astype(dtype),
            b_hid[:, :, None, :],                                        # (NB,L-1,1,H)
            w_head,
            b_head)


if __name__ == "__main__":
    # Small, module-consistent shapes: input_chunk_length = seq_len,
    # output_chunk_length = pred_len, univariate series.
    B, seq_len, pred_len = 2, 16, 8
    hidden, num_blocks, num_layers = 32, 3, 4

    key = jax.random.PRNGKey(0)
    k_x, k_p = jax.random.split(key)
    x_enc = jax.random.normal(k_x, (B, seq_len, 1), jnp.float32)
    raw = init_params(k_p, num_blocks, num_layers, seq_len, pred_len, hidden)
    packed = pack_params(raw, dtype=jnp.bfloat16)

    out = nbeats_forward(x_enc, packed)
    out = jax.block_until_ready(out)

    ref = nbeats_reference(x_enc, packed)
    assert out.shape == (B, pred_len, 1), out.shape
    assert jnp.allclose(out, ref, atol=5e-3, rtol=5e-3), \
        float(jnp.max(jnp.abs(out - ref)))

    print("KERNEL_OK")
</pallas_src>

<mosaic_0001>
module attributes {stable_mosaic.version = 11 : i64} {
  func.func @_nbeats_kernel(%arg0: i32, %arg1: memref<8x16xf32, #tpu.memory_space<vmem>>, %arg2: memref<3x16x32xbf16, #tpu.memory_space<vmem>>, %arg3: memref<3x1x32xf32, #tpu.memory_space<vmem>>, %arg4: memref<3x3x32x32xbf16, #tpu.memory_space<vmem>>, %arg5: memref<3x3x1x32xf32, #tpu.memory_space<vmem>>, %arg6: memref<3x32x24xbf16, #tpu.memory_space<vmem>>, %arg7: memref<3x1x24xf32, #tpu.memory_space<vmem>>, %arg8: memref<8x8xf32, #tpu.memory_space<vmem>>) attributes {dimension_semantics = [#tpu.dimension_semantics<parallel>], iteration_bounds = array<i64: 1>, scalar_prefetch = 0 : i64, scratch_operands = 0 : i64, tpu.core_type = #tpu.core_type<tc>, window_params = [{transform_indices = @transform_0, window_bounds = array<i64: 8, 16>}, {pipeline_mode = #tpu.pipeline_mode<synchronous>, transform_indices = @transform_1, window_bounds = array<i64: 3, 16, 32>}, {pipeline_mode = #tpu.pipeline_mode<synchronous>, transform_indices = @transform_2, window_bounds = array<i64: 3, 1, 32>}, {pipeline_mode = #tpu.pipeline_mode<synchronous>, transform_indices = @transform_3, window_bounds = array<i64: 3, 3, 32, 32>}, {pipeline_mode = #tpu.pipeline_mode<synchronous>, transform_indices = @transform_4, window_bounds = array<i64: 3, 3, 1, 32>}, {pipeline_mode = #tpu.pipeline_mode<synchronous>, transform_indices = @transform_5, window_bounds = array<i64: 3, 32, 24>}, {pipeline_mode = #tpu.pipeline_mode<synchronous>, transform_indices = @transform_6, window_bounds = array<i64: 3, 1, 24>}, {transform_indices = @transform_7, window_bounds = array<i64: 8, 8>}]} {
    %c0 = arith.constant 0 : index
    %c0_0 = arith.constant 0 : index
    %0 = vector.load %arg1[%c0, %c0_0] : memref<8x16xf32, #tpu.memory_space<vmem>>, vector<8x16xf32>
    %cst = arith.constant 0.000000e+00 : f32
    %1 = vector.broadcast %cst : f32 to vector<8x8xf32>
    %2 = arith.truncf %0 : vector<8x16xf32> to vector<8x16xbf16>
    %c0_1 = arith.constant 0 : index
    %c0_2 = arith.constant 0 : index
    %c0_3 = arith.constant 0 : index
    %3 = vector.load %arg2[%c0_1, %c0_2, %c0_3] : memref<3x16x32xbf16, #tpu.memory_space<vmem>>, vector<1x16x32xbf16>
    %4 = vector.shape_cast %3 : vector<1x16x32xbf16> to vector<16x32xbf16>
    %cst_4 = arith.constant dense<0.000000e+00> : vector<8x32xf32>
    %5 = tpu.matmul %2, %4, %cst_4 {dimension_numbers = #tpu.dot_dimension_numbers<[1], [0], [0], [1], [0, 0, 1, 1], [], []>} : vector<8x16xbf16>, vector<16x32xbf16>, vector<8x32xf32> -> vector<8x32xf32>
    %c0_5 = arith.constant 0 : index
    %c0_6 = arith.constant 0 : index
    %c0_7 = arith.constant 0 : index
    %6 = vector.load %arg3[%c0_5, %c0_6, %c0_7] : memref<3x1x32xf32, #tpu.memory_space<vmem>>, vector<1x1x32xf32>
    %7 = vector.shape_cast %6 : vector<1x1x32xf32> to vector<1x32xf32>
    %8 = vector.broadcast %7 : vector<1x32xf32> to vector<8x32xf32>
    %9 = arith.addf %5, %8 : vector<8x32xf32>
    %cst_8 = arith.constant 0.000000e+00 : f32
    %10 = vector.broadcast %cst_8 : f32 to vector<8x32xf32>
    %11 = arith.maximumf %9, %10 : vector<8x32xf32>
    %12 = arith.truncf %11 : vector<8x32xf32> to vector<8x32xbf16>
    %c0_9 = arith.constant 0 : index
    %c0_10 = arith.constant 0 : index
    %c0_11 = arith.constant 0 : index
    %c0_12 = arith.constant 0 : index
    %13 = vector.load %arg4[%c0_9, %c0_10, %c0_11, %c0_12] : memref<3x3x32x32xbf16, #tpu.memory_space<vmem>>, vector<1x1x32x32xbf16>
    %14 = vector.shape_cast %13 : vector<1x1x32x32xbf16> to vector<32x32xbf16>
    %cst_13 = arith.constant dense<0.000000e+00> : vector<8x32xf32>
    %15 = tpu.matmul %12, %14, %cst_13 {dimension_numbers = #tpu.dot_dimension_numbers<[1], [0], [0], [1], [0, 0, 1, 1], [], []>} : vector<8x32xbf16>, vector<32x32xbf16>, vector<8x32xf32> -> vector<8x32xf32>
    %c0_14 = arith.constant 0 : index
    %c0_15 = arith.constant 0 : index
    %c0_16 = arith.constant 0 : index
    %c0_17 = arith.constant 0 : index
    %16 = vector.load %arg5[%c0_14, %c0_15, %c0_16, %c0_17] : memref<3x3x1x32xf32, #tpu.memory_space<vmem>>, vector<1x1x1x32xf32>
    %17 = vector.shape_cast %16 : vector<1x1x1x32xf32> to vector<1x32xf32>
    %18 = vector.broadcast %17 : vector<1x32xf32> to vector<8x32xf32>
    %19 = arith.addf %15, %18 : vector<8x32xf32>
    %cst_18 = arith.constant 0.000000e+00 : f32
    %20 = vector.broadcast %cst_18 : f32 to vector<8x32xf32>
    %21 = arith.maximumf %19, %20 : vector<8x32xf32>
    %22 = arith.truncf %21 : vector<8x32xf32> to vector<8x32xbf16>
    %c0_19 = arith.constant 0 : index
    %c1 = arith.constant 1 : index
    %c0_20 = arith.constant 0 : index
    %c0_21 = arith.constant 0 : index
    %23 = vector.load %arg4[%c0_19, %c1, %c0_20, %c0_21] : memref<3x3x32x32xbf16, #tpu.memory_space<vmem>>, vector<1x1x32x32xbf16>
    %24 = vector.shape_cast %23 : vector<1x1x32x32xbf16> to vector<32x32xbf16>
    %cst_22 = arith.constant dense<0.000000e+00> : vector<8x32xf32>
    %25 = tpu.matmul %22, %24, %cst_22 {dimension_numbers = #tpu.dot_dimension_numbers<[1], [0], [0], [1], [0, 0, 1, 1], [], []>} : vector<8x32xbf16>, vector<32x32xbf16>, vector<8x32xf32> -> vector<8x32xf32>
    %c0_23 = arith.constant 0 : index
    %c1_24 = arith.constant 1 : index
    %c0_25 = arith.constant 0 : index
    %c0_26 = arith.constant 0 : index
    %26 = vector.load %arg5[%c0_23, %c1_24, %c0_25, %c0_26] : memref<3x3x1x32xf32, #tpu.memory_space<vmem>>, vector<1x1x1x32xf32>
    %27 = vector.shape_cast %26 : vector<1x1x1x32xf32> to vector<1x32xf32>
    %28 = vector.broadcast %27 : vector<1x32xf32> to vector<8x32xf32>
    %29 = arith.addf %25, %28 : vector<8x32xf32>
    %cst_27 = arith.constant 0.000000e+00 : f32
    %30 = vector.broadcast %cst_27 : f32 to vector<8x32xf32>
    %31 = arith.maximumf %29, %30 : vector<8x32xf32>
    %32 = arith.truncf %31 : vector<8x32xf32> to vector<8x32xbf16>
    %c0_28 = arith.constant 0 : index
    %c2 = arith.constant 2 : index
    %c0_29 = arith.constant 0 : index
    %c0_30 = arith.constant 0 : index
    %33 = vector.load %arg4[%c0_28, %c2, %c0_29, %c0_30] : memref<3x3x32x32xbf16, #tpu.memory_space<vmem>>, vector<1x1x32x32xbf16>
    %34 = vector.shape_cast %33 : vector<1x1x32x32xbf16> to vector<32x32xbf16>
    %cst_31 = arith.constant dense<0.000000e+00> : vector<8x32xf32>
    %35 = tpu.matmul %32, %34, %cst_31 {dimension_numbers = #tpu.dot_dimension_numbers<[1], [0], [0], [1], [0, 0, 1, 1], [], []>} : vector<8x32xbf16>, vector<32x32xbf16>, vector<8x32xf32> -> vector<8x32xf32>
    %c0_32 = arith.constant 0 : index
    %c2_33 = arith.constant 2 : index
    %c0_34 = arith.constant 0 : index
    %c0_35 = arith.constant 0 : index
    %36 = vector.load %arg5[%c0_32, %c2_33, %c0_34, %c0_35] : memref<3x3x1x32xf32, #tpu.memory_space<vmem>>, vector<1x1x1x32xf32>
    %37 = vector.shape_cast %36 : vector<1x1x1x32xf32> to vector<1x32xf32>
    %38 = vector.broadcast %37 : vector<1x32xf32> to vector<8x32xf32>
    %39 = arith.addf %35, %38 : vector<8x32xf32>
    %cst_36 = arith.constant 0.000000e+00 : f32
    %40 = vector.broadcast %cst_36 : f32 to vector<8x32xf32>
    %41 = arith.maximumf %39, %40 : vector<8x32xf32>
    %42 = arith.truncf %41 : vector<8x32xf32> to vector<8x32xbf16>
    %c0_37 = arith.constant 0 : index
    %c0_38 = arith.constant 0 : index
    %c0_39 = arith.constant 0 : index
    %43 = vector.load %arg6[%c0_37, %c0_38, %c0_39] : memref<3x32x24xbf16, #tpu.memory_space<vmem>>, vector<1x32x24xbf16>
    %44 = vector.shape_cast %43 : vector<1x32x24xbf16> to vector<32x24xbf16>
    %cst_40 = arith.constant dense<0.000000e+00> : vector<8x24xf32>
    %45 = tpu.matmul %42, %44, %cst_40 {dimension_numbers = #tpu.dot_dimension_numbers<[1], [0], [0], [1], [0, 0, 1, 1], [], []>} : vector<8x32xbf16>, vector<32x24xbf16>, vector<8x24xf32> -> vector<8x24xf32>
    %c0_41 = arith.constant 0 : index
    %c0_42 = arith.constant 0 : index
    %c0_43 = arith.constant 0 : index
    %46 = vector.load %arg7[%c0_41, %c0_42, %c0_43] : memref<3x1x24xf32, #tpu.memory_space<vmem>>, vector<1x1x24xf32>
    %47 = vector.shape_cast %46 : vector<1x1x24xf32> to vector<1x24xf32>
    %48 = vector.broadcast %47 : vector<1x24xf32> to vector<8x24xf32>
    %49 = arith.addf %45, %48 : vector<8x24xf32>
    %50 = vector.extract_strided_slice %49 {offsets = [0, 0], sizes = [8, 16], strides = [1, 1]} : vector<8x24xf32> to vector<8x16xf32>
    %51 = arith.subf %0, %50 : vector<8x16xf32>
    %52 = vector.extract_strided_slice %49 {offsets = [0, 16], sizes = [8, 8], strides = [1, 1]} : vector<8x24xf32> to vector<8x8xf32>
    %53 = arith.addf %1, %52 : vector<8x8xf32>
    %54 = arith.truncf %51 : vector<8x16xf32> to vector<8x16xbf16>
    %c1_44 = arith.constant 1 : index
    %c0_45 = arith.constant 0 : index
    %c0_46 = arith.constant 0 : index
    %55 = vector.load %arg2[%c1_44, %c0_45, %c0_46] : memref<3x16x32xbf16, #tpu.memory_space<vmem>>, vector<1x16x32xbf16>
    %56 = vector.shape_cast %55 : vector<1x16x32xbf16> to vector<16x32xbf16>
    %cst_47 = arith.constant dense<0.000000e+00> : vector<8x32xf32>
    %57 = tpu.matmul %54, %56, %cst_47 {dimension_numbers = #tpu.dot_dimension_numbers<[1], [0], [0], [1], [0, 0, 1, 1], [], []>} : vector<8x16xbf16>, vector<16x32xbf16>, vector<8x32xf32> -> vector<8x32xf32>
    %c1_48 = arith.constant 1 : index
    %c0_49 = arith.constant 0 : index
    %c0_50 = arith.constant 0 : index
    %58 = vector.load %arg3[%c1_48, %c0_49, %c0_50] : memref<3x1x32xf32, #tpu.memory_space<vmem>>, vector<1x1x32xf32>
    %59 = vector.shape_cast %58 : vector<1x1x32xf32> to vector<1x32xf32>
    %60 = vector.broadcast %59 : vector<1x32xf32> to vector<8x32xf32>
    %61 = arith.addf %57, %60 : vector<8x32xf32>
    %cst_51 = arith.constant 0.000000e+00 : f32
    %62 = vector.broadcast %cst_51 : f32 to vector<8x32xf32>
    %63 = arith.maximumf %61, %62 : vector<8x32xf32>
    %64 = arith.truncf %63 : vector<8x32xf32> to vector<8x32xbf16>
    %c1_52 = arith.constant 1 : index
    %c0_53 = arith.constant 0 : index
    %c0_54 = arith.constant 0 : index
    %c0_55 = arith.constant 0 : index
    %65 = vector.load %arg4[%c1_52, %c0_53, %c0_54, %c0_55] : memref<3x3x32x32xbf16, #tpu.memory_space<vmem>>, vector<1x1x32x32xbf16>
    %66 = vector.shape_cast %65 : vector<1x1x32x32xbf16> to vector<32x32xbf16>
    %cst_56 = arith.constant dense<0.000000e+00> : vector<8x32xf32>
    %67 = tpu.matmul %64, %66, %cst_56 {dimension_numbers = #tpu.dot_dimension_numbers<[1], [0], [0], [1], [0, 0, 1, 1], [], []>} : vector<8x32xbf16>, vector<32x32xbf16>, vector<8x32xf32> -> vector<8x32xf32>
    %c1_57 = arith.constant 1 : index
    %c0_58 = arith.constant 0 : index
    %c0_59 = arith.constant 0 : index
    %c0_60 = arith.constant 0 : index
    %68 = vector.load %arg5[%c1_57, %c0_58, %c0_59, %c0_60] : memref<3x3x1x32xf32, #tpu.memory_space<vmem>>, vector<1x1x1x32xf32>
    %69 = vector.shape_cast %68 : vector<1x1x1x32xf32> to vector<1x32xf32>
    %70 = vector.broadcast %69 : vector<1x32xf32> to vector<8x32xf32>
    %71 = arith.addf %67, %70 : vector<8x32xf32>
    %cst_61 = arith.constant 0.000000e+00 : f32
    %72 = vector.broadcast %cst_61 : f32 to vector<8x32xf32>
    %73 = arith.maximumf %71, %72 : vector<8x32xf32>
    %74 = arith.truncf %73 : vector<8x32xf32> to vector<8x32xbf16>
    %c1_62 = arith.constant 1 : index
    %c1_63 = arith.constant 1 : index
    %c0_64 = arith.constant 0 : index
    %c0_65 = arith.constant 0 : index
    %75 = vector.load %arg4[%c1_62, %c1_63, %c0_64, %c0_65] : memref<3x3x32x32xbf16, #tpu.memory_space<vmem>>, vector<1x1x32x32xbf16>
    %76 = vector.shape_cast %75 : vector<1x1x32x32xbf16> to vector<32x32xbf16>
    %cst_66 = arith.constant dense<0.000000e+00> : vector<8x32xf32>
    %77 = tpu.matmul %74, %76, %cst_66 {dimension_numbers = #tpu.dot_dimension_numbers<[1], [0], [0], [1], [0, 0, 1, 1], [], []>} : vector<8x32xbf16>, vector<32x32xbf16>, vector<8x32xf32> -> vector<8x32xf32>
    %c1_67 = arith.constant 1 : index
    %c1_68 = arith.constant 1 : index
    %c0_69 = arith.constant 0 : index
    %c0_70 = arith.constant 0 : index
    %78 = vector.load %arg5[%c1_67, %c1_68, %c0_69, %c0_70] : memref<3x3x1x32xf32, #tpu.memory_space<vmem>>, vector<1x1x1x32xf32>
    %79 = vector.shape_cast %78 : vector<1x1x1x32xf32> to vector<1x32xf32>
    %80 = vector.broadcast %79 : vector<1x32xf32> to vector<8x32xf32>
    %81 = arith.addf %77, %80 : vector<8x32xf32>
    %cst_71 = arith.constant 0.000000e+00 : f32
    %82 = vector.broadcast %cst_71 : f32 to vector<8x32xf32>
    %83 = arith.maximumf %81, %82 : vector<8x32xf32>
    %84 = arith.truncf %83 : vector<8x32xf32> to vector<8x32xbf16>
    %c1_72 = arith.constant 1 : index
    %c2_73 = arith.constant 2 : index
    %c0_74 = arith.constant 0 : index
    %c0_75 = arith.constant 0 : index
    %85 = vector.load %arg4[%c1_72, %c2_73, %c0_74, %c0_75] : memref<3x3x32x32xbf16, #tpu.memory_space<vmem>>, vector<1x1x32x32xbf16>
    %86 = vector.shape_cast %85 : vector<1x1x32x32xbf16> to vector<32x32xbf16>
    %cst_76 = arith.constant dense<0.000000e+00> : vector<8x32xf32>
    %87 = tpu.matmul %84, %86, %cst_76 {dimension_numbers = #tpu.dot_dimension_numbers<[1], [0], [0], [1], [0, 0, 1, 1], [], []>} : vector<8x32xbf16>, vector<32x32xbf16>, vector<8x32xf32> -> vector<8x32xf32>
    %c1_77 = arith.constant 1 : index
    %c2_78 = arith.constant 2 : index
    %c0_79 = arith.constant 0 : index
    %c0_80 = arith.constant 0 : index
    %88 = vector.load %arg5[%c1_77, %c2_78, %c0_79, %c0_80] : memref<3x3x1x32xf32, #tpu.memory_space<vmem>>, vector<1x1x1x32xf32>
    %89 = vector.shape_cast %88 : vector<1x1x1x32xf32> to vector<1x32xf32>
    %90 = vector.broadcast %89 : vector<1x32xf32> to vector<8x32xf32>
    %91 = arith.addf %87, %90 : vector<8x32xf32>
    %cst_81 = arith.constant 0.000000e+00 : f32
    %92 = vector.broadcast %cst_81 : f32 to vector<8x32xf32>
    %93 = arith.maximumf %91, %92 : vector<8x32xf32>
    %94 = arith.truncf %93 : vector<8x32xf32> to vector<8x32xbf16>
    %c1_82 = arith.constant 1 : index
    %c0_83 = arith.constant 0 : index
    %c0_84 = arith.constant 0 : index
    %95 = vector.load %arg6[%c1_82, %c0_83, %c0_84] : memref<3x32x24xbf16, #tpu.memory_space<vmem>>, vector<1x32x24xbf16>
    %96 = vector.shape_cast %95 : vector<1x32x24xbf16> to vector<32x24xbf16>
    %cst_85 = arith.constant dense<0.000000e+00> : vector<8x24xf32>
    %97 = tpu.matmul %94, %96, %cst_85 {dimension_numbers = #tpu.dot_dimension_numbers<[1], [0], [0], [1], [0, 0, 1, 1], [], []>} : vector<8x32xbf16>, vector<32x24xbf16>, vector<8x24xf32> -> vector<8x24xf32>
    %c1_86 = arith.constant 1 : index
    %c0_87 = arith.constant 0 : index
    %c0_88 = arith.constant 0 : index
    %98 = vector.load %arg7[%c1_86, %c0_87, %c0_88] : memref<3x1x24xf32, #tpu.memory_space<vmem>>, vector<1x1x24xf32>
    %99 = vector.shape_cast %98 : vector<1x1x24xf32> to vector<1x24xf32>
    %100 = vector.broadcast %99 : vector<1x24xf32> to vector<8x24xf32>
    %101 = arith.addf %97, %100 : vector<8x24xf32>
    %102 = vector.extract_strided_slice %101 {offsets = [0, 0], sizes = [8, 16], strides = [1, 1]} : vector<8x24xf32> to vector<8x16xf32>
    %103 = arith.subf %51, %102 : vector<8x16xf32>
    %104 = vector.extract_strided_slice %101 {offsets = [0, 16], sizes = [8, 8], strides = [1, 1]} : vector<8x24xf32> to vector<8x8xf32>
    %105 = arith.addf %53, %104 : vector<8x8xf32>
    %106 = arith.truncf %103 : vector<8x16xf32> to vector<8x16xbf16>
    %c2_89 = arith.constant 2 : index
    %c0_90 = arith.constant 0 : index
    %c0_91 = arith.constant 0 : index
    %107 = vector.load %arg2[%c2_89, %c0_90, %c0_91] : memref<3x16x32xbf16, #tpu.memory_space<vmem>>, vector<1x16x32xbf16>
    %108 = vector.shape_cast %107 : vector<1x16x32xbf16> to vector<16x32xbf16>
    %cst_92 = arith.constant dense<0.000000e+00> : vector<8x32xf32>
    %109 = tpu.matmul %106, %108, %cst_92 {dimension_numbers = #tpu.dot_dimension_numbers<[1], [0], [0], [1], [0, 0, 1, 1], [], []>} : vector<8x16xbf16>, vector<16x32xbf16>, vector<8x32xf32> -> vector<8x32xf32>
    %c2_93 = arith.constant 2 : index
    %c0_94 = arith.constant 0 : index
    %c0_95 = arith.constant 0 : index
    %110 = vector.load %arg3[%c2_93, %c0_94, %c0_95] : memref<3x1x32xf32, #tpu.memory_space<vmem>>, vector<1x1x32xf32>
    %111 = vector.shape_cast %110 : vector<1x1x32xf32> to vector<1x32xf32>
    %112 = vector.broadcast %111 : vector<1x32xf32> to vector<8x32xf32>
    %113 = arith.addf %109, %112 : vector<8x32xf32>
    %cst_96 = arith.constant 0.000000e+00 : f32
    %114 = vector.broadcast %cst_96 : f32 to vector<8x32xf32>
    %115 = arith.maximumf %113, %114 : vector<8x32xf32>
    %116 = arith.truncf %115 : vector<8x32xf32> to vector<8x32xbf16>
    %c2_97 = arith.constant 2 : index
    %c0_98 = arith.constant 0 : index
    %c0_99 = arith.constant 0 : index
    %c0_100 = arith.constant 0 : index
    %117 = vector.load %arg4[%c2_97, %c0_98, %c0_99, %c0_100] : memref<3x3x32x32xbf16, #tpu.memory_space<vmem>>, vector<1x1x32x32xbf16>
    %118 = vector.shape_cast %117 : vector<1x1x32x32xbf16> to vector<32x32xbf16>
    %cst_101 = arith.constant dense<0.000000e+00> : vector<8x32xf32>
    %119 = tpu.matmul %116, %118, %cst_101 {dimension_numbers = #tpu.dot_dimension_numbers<[1], [0], [0], [1], [0, 0, 1, 1], [], []>} : vector<8x32xbf16>, vector<32x32xbf16>, vector<8x32xf32> -> vector<8x32xf32>
    %c2_102 = arith.constant 2 : index
    %c0_103 = arith.constant 0 : index
    %c0_104 = arith.constant 0 : index
    %c0_105 = arith.constant 0 : index
    %120 = vector.load %arg5[%c2_102, %c0_103, %c0_104, %c0_105] : memref<3x3x1x32xf32, #tpu.memory_space<vmem>>, vector<1x1x1x32xf32>
    %121 = vector.shape_cast %120 : vector<1x1x1x32xf32> to vector<1x32xf32>
    %122 = vector.broadcast %121 : vector<1x32xf32> to vector<8x32xf32>
    %123 = arith.addf %119, %122 : vector<8x32xf32>
    %cst_106 = arith.constant 0.000000e+00 : f32
    %124 = vector.broadcast %cst_106 : f32 to vector<8x32xf32>
    %125 = arith.maximumf %123, %124 : vector<8x32xf32>
    %126 = arith.truncf %125 : vector<8x32xf32> to vector<8x32xbf16>
    %c2_107 = arith.constant 2 : index
    %c1_108 = arith.constant 1 : index
    %c0_109 = arith.constant 0 : index
    %c0_110 = arith.constant 0 : index
    %127 = vector.load %arg4[%c2_107, %c1_108, %c0_109, %c0_110] : memref<3x3x32x32xbf16, #tpu.memory_space<vmem>>, vector<1x1x32x32xbf16>
    %128 = vector.shape_cast %127 : vector<1x1x32x32xbf16> to vector<32x32xbf16>
    %cst_111 = arith.constant dense<0.000000e+00> : vector<8x32xf32>
    %129 = tpu.matmul %126, %128, %cst_111 {dimension_numbers = #tpu.dot_dimension_numbers<[1], [0], [0], [1], [0, 0, 1, 1], [], []>} : vector<8x32xbf16>, vector<32x32xbf16>, vector<8x32xf32> -> vector<8x32xf32>
    %c2_112 = arith.constant 2 : index
    %c1_113 = arith.constant 1 : index
    %c0_114 = arith.constant 0 : index
    %c0_115 = arith.constant 0 : index
    %130 = vector.load %arg5[%c2_112, %c1_113, %c0_114, %c0_115] : memref<3x3x1x32xf32, #tpu.memory_space<vmem>>, vector<1x1x1x32xf32>
    %131 = vector.shape_cast %130 : vector<1x1x1x32xf32> to vector<1x32xf32>
    %132 = vector.broadcast %131 : vector<1x32xf32> to vector<8x32xf32>
    %133 = arith.addf %129, %132 : vector<8x32xf32>
    %cst_116 = arith.constant 0.000000e+00 : f32
    %134 = vector.broadcast %cst_116 : f32 to vector<8x32xf32>
    %135 = arith.maximumf %133, %134 : vector<8x32xf32>
    %136 = arith.truncf %135 : vector<8x32xf32> to vector<8x32xbf16>
    %c2_117 = arith.constant 2 : index
    %c2_118 = arith.constant 2 : index
    %c0_119 = arith.constant 0 : index
    %c0_120 = arith.constant 0 : index
    %137 = vector.load %arg4[%c2_117, %c2_118, %c0_119, %c0_120] : memref<3x3x32x32xbf16, #tpu.memory_space<vmem>>, vector<1x1x32x32xbf16>
    %138 = vector.shape_cast %137 : vector<1x1x32x32xbf16> to vector<32x32xbf16>
    %cst_121 = arith.constant dense<0.000000e+00> : vector<8x32xf32>
    %139 = tpu.matmul %136, %138, %cst_121 {dimension_numbers = #tpu.dot_dimension_numbers<[1], [0], [0], [1], [0, 0, 1, 1], [], []>} : vector<8x32xbf16>, vector<32x32xbf16>, vector<8x32xf32> -> vector<8x32xf32>
    %c2_122 = arith.constant 2 : index
    %c2_123 = arith.constant 2 : index
    %c0_124 = arith.constant 0 : index
    %c0_125 = arith.constant 0 : index
    %140 = vector.load %arg5[%c2_122, %c2_123, %c0_124, %c0_125] : memref<3x3x1x32xf32, #tpu.memory_space<vmem>>, vector<1x1x1x32xf32>
    %141 = vector.shape_cast %140 : vector<1x1x1x32xf32> to vector<1x32xf32>
    %142 = vector.broadcast %141 : vector<1x32xf32> to vector<8x32xf32>
    %143 = arith.addf %139, %142 : vector<8x32xf32>
    %cst_126 = arith.constant 0.000000e+00 : f32
    %144 = vector.broadcast %cst_126 : f32 to vector<8x32xf32>
    %145 = arith.maximumf %143, %144 : vector<8x32xf32>
    %146 = arith.truncf %145 : vector<8x32xf32> to vector<8x32xbf16>
    %c2_127 = arith.constant 2 : index
    %c0_128 = arith.constant 0 : index
    %c0_129 = arith.constant 0 : index
    %147 = vector.load %arg6[%c2_127, %c0_128, %c0_129] : memref<3x32x24xbf16, #tpu.memory_space<vmem>>, vector<1x32x24xbf16>
    %148 = vector.shape_cast %147 : vector<1x32x24xbf16> to vector<32x24xbf16>
    %cst_130 = arith.constant dense<0.000000e+00> : vector<8x24xf32>
    %149 = tpu.matmul %146, %148, %cst_130 {dimension_numbers = #tpu.dot_dimension_numbers<[1], [0], [0], [1], [0, 0, 1, 1], [], []>} : vector<8x32xbf16>, vector<32x24xbf16>, vector<8x24xf32> -> vector<8x24xf32>
    %c2_131 = arith.constant 2 : index
    %c0_132 = arith.constant 0 : index
    %c0_133 = arith.constant 0 : index
    %150 = vector.load %arg7[%c2_131, %c0_132, %c0_133] : memref<3x1x24xf32, #tpu.memory_space<vmem>>, vector<1x1x24xf32>
    %151 = vector.shape_cast %150 : vector<1x1x24xf32> to vector<1x24xf32>
    %152 = vector.broadcast %151 : vector<1x24xf32> to vector<8x24xf32>
    %153 = arith.addf %149, %152 : vector<8x24xf32>
    %154 = vector.extract_strided_slice %153 {offsets = [0, 16], sizes = [8, 8], strides = [1, 1]} : vector<8x24xf32> to vector<8x8xf32>
    %155 = arith.addf %105, %154 : vector<8x8xf32>
    %c0_134 = arith.constant 0 : index
    %c0_135 = arith.constant 0 : index
    %156 = vector.load %arg8[%c0_134, %c0_135] : memref<8x8xf32, #tpu.memory_space<vmem>>, vector<8x8xf32>
    tpu.vector_store %arg8[%c0_134, %c0_135], %155 {strides = array<i32>} : memref<8x8xf32, #tpu.memory_space<vmem>>, vector<8x8xf32>,
    return
  }
  func.func @transform_0(%arg0: i32) -> (i32, i32) {
    %c0_i32 = arith.constant 0 : i32
    %c0_i32_0 = arith.constant 0 : i32
    return %arg0, %c0_i32 : i32, i32
  }
  func.func @transform_1(%arg0: i32) -> (i32, i32, i32) {
    %c0_i32 = arith.constant 0 : i32
    %c0_i32_0 = arith.constant 0 : i32
    %c0_i32_1 = arith.constant 0 : i32
    %c0_i32_2 = arith.constant 0 : i32
    return %c0_i32, %c0_i32_0, %c0_i32_1 : i32, i32, i32
  }
  func.func @transform_2(%arg0: i32) -> (i32, i32, i32) {
    %c0_i32 = arith.constant 0 : i32
    %c0_i32_0 = arith.constant 0 : i32
    %c0_i32_1 = arith.constant 0 : i32
    %c0_i32_2 = arith.constant 0 : i32
    return %c0_i32, %c0_i32_0, %c0_i32_1 : i32, i32, i32
  }
  func.func @transform_3(%arg0: i32) -> (i32, i32, i32, i32) {
    %c0_i32 = arith.constant 0 : i32
    %c0_i32_0 = arith.constant 0 : i32
    %c0_i32_1 = arith.constant 0 : i32
    %c0_i32_2 = arith.constant 0 : i32
    %c0_i32_3 = arith.constant 0 : i32
    return %c0_i32, %c0_i32_0, %c0_i32_1, %c0_i32_2 : i32, i32, i32, i32
  }
  func.func @transform_4(%arg0: i32) -> (i32, i32, i32, i32) {
    %c0_i32 = arith.constant 0 : i32
    %c0_i32_0 = arith.constant 0 : i32
    %c0_i32_1 = arith.constant 0 : i32
    %c0_i32_2 = arith.constant 0 : i32
    %c0_i32_3 = arith.constant 0 : i32
    return %c0_i32, %c0_i32_0, %c0_i32_1, %c0_i32_2 : i32, i32, i32, i32
  }
  func.func @transform_5(%arg0: i32) -> (i32, i32, i32) {
    %c0_i32 = arith.constant 0 : i32
    %c0_i32_0 = arith.constant 0 : i32
    %c0_i32_1 = arith.constant 0 : i32
    %c0_i32_2 = arith.constant 0 : i32
    return %c0_i32, %c0_i32_0, %c0_i32_1 : i32, i32, i32
  }
  func.func @transform_6(%arg0: i32) -> (i32, i32, i32) {
    %c0_i32 = arith.constant 0 : i32
    %c0_i32_0 = arith.constant 0 : i32
    %c0_i32_1 = arith.constant 0 : i32
    %c0_i32_2 = arith.constant 0 : i32
    return %c0_i32, %c0_i32_0, %c0_i32_1 : i32, i32, i32
  }
  func.func @transform_7(%arg0: i32) -> (i32, i32) {
    %c0_i32 = arith.constant 0 : i32
    %c0_i32_0 = arith.constant 0 : i32
    return %arg0, %c0_i32 : i32, i32
  }
}

</mosaic_0001>

<bundles_post_ra>
// kernel: tpu_custom_call.1
= control target key start
LH: loop header
LB: loop body
LE: loop exit
PB: predicated region body
PF: predicated region fallthrough
CT: control target
= control target key end

     0   :  { %12 = vsyncpa [#allocation3], 0  ;;  %s1033_s0 = inlined_call_operand.vmem [shape: f32[8,16], index: 0, kind: input, shape index: {}]   ;;  %s1034_s1 = inlined_call_operand.vmem [shape: bf16[3,16,32], index: 1, kind: input, shape index: {}]   ;;  %s1035_s2 = inlined_call_operand.vmem [shape: f32[3,1,32], index: 2, kind: input, shape index: {}]   ;;  %s1036_s3 = inlined_call_operand.hbm [shape: bf16[3,3,32,32], index: 3, kind: input, shape index: {}]   ;;  %s1037_s4 = inlined_call_operand.vmem [shape: f32[3,3,1,32], index: 4, kind: input, shape index: {}]   ;;  %s1038_s5 = inlined_call_operand.vmem [shape: bf16[3,32,24], index: 5, kind: input, shape index: {}]   ;;  %s1039_s6 = inlined_call_operand.vmem [shape: f32[3,1,24], index: 6, kind: input, shape index: {}]   ;;  %s1040_s7 = inlined_call_operand.hbm [shape: f32[8,8], index: 7, kind: output, shape index: {}]  }
   0x1   :  { %13 = vsyncpa [#allocation4], 0  ;;  %s24_s26 = sshll.u32 %s1036_s3, 4  ;;  %s888_s27 = smov [#allocation2]   ;;  %s25_s26 = int_to_ptr.hbm [resolvable:$true] %s24_s26 }
   0x2   :  { %s26_s28 = sshll.u32 %s888_s27, 4  ;;  %s889_s29 = smov 64   ;;  %s27_s28 = int_to_ptr.vmem [resolvable:$true] %s26_s28 }
   0x3   :  { %s890_s30 = smov 4  }
   0x4   :  { %32 = dma.hbm_to_vmem [thread:$0]  %s25_s26, 2304, %s27_s28, [#allocation3], %s889_s29, %s889_s29, %s890_s30  }
   0x5   :  { %884 = dma.done.wait [#allocation3], 2304  }
   0x6   :  { %885 = vsyncadd [#allocation3], 4294964992  ;;  %v789_v0 = vld [vmem:[%s1034_s1] sm:$0xff]  ;;  %vm58_vm0 = vcmask 130048   ;;  %v791_v3 = vld [vmem:[#allocation2 + $0x8] sm:$0xff]  ;;  %vm97_vm1 = vcmask 261120  }
   0x7   :  { %v44_v1 = vld [vmem:[%s1033_s0] sm:$0xff]  ;;  %69 = vmatpush.bf16.msra.mxu0 %v789_v0  ;;  %107 = vmatpush.bf16.msra.mxu1 %v791_v3  ;;  %v793_v11 = vld [vmem:[#allocation2 + $0x18] sm:$0xff]  ;;  %v792_v12 = vld [vmem:[#allocation2 + $0x10] sm:$0xff]  ;;  %s891_s28 = smov 112   ;;  %s632_s9 = sshll.u32 %s1040_s7, 4  ;;  %vm623_vm2 = vcmask 64512   ;;  %s633_s9 = int_to_ptr.hbm [resolvable:$true] %s632_s9 }
   0x8   :  { %v45_v2 = vpack.c.bf16 %v44_v1, %v44_v1  ;;  %v790_v4 = vld [vmem:[#allocation2] sm:$0xff]  ;;  %147 = vmatpush.bf16.msra.mxu2 %v793_v11  ;;  %v795_v19 = vld [vmem:[#allocation2 + $0x28] sm:$0xff]  ;;  %v800_v36 = vld [vmem:[#allocation2 + $0x38] sm:$0xff] }
   0x9   :  { %v821_v5 = vld [vmem:[%s1035_s2] ss:$0 sm:$0xff]  ;;  %187 = vmatpush.bf16.msra.mxu3 %v795_v19  ;;  %v797_v21 = vld [vmem:[%s1038_s5 + $0x8] sm:$0xff]  ;;  %v823_v23 = vld [vmem:[%s1037_s4 + $0x1] ss:$0 sm:$0xff] }
   0xa   :  { %646 = vmatmul.msk.bf16.vlgmr.msra.gmra.mxu0 %vm58_vm0, %v45_v2  ;;  %v822_v13 = vld [vmem:[%s1037_s4] ss:$0 sm:$0xff]  ;;  %v798_v29 = vld [vmem:[%s1034_s1 + $0x8] sm:$0xff]  ;;  %v824_v30 = vld [vmem:[%s1037_s4 + $0x2] ss:$0 sm:$0xff] }
   0xb   :  { %108 = vmatpush.bf16.msra.mxu1 %v790_v4  ;;  %v794_v20 = vld [vmem:[#allocation2 + $0x20] sm:$0xff]  ;;  %225 = vmatpush.bf16.msrb.mxu0 %v797_v21  ;;  %v799_v37 = vld [vmem:[#allocation2 + $0x30] sm:$0xff]  ;;  %v802_v44 = vld [vmem:[#allocation2 + $0x48] sm:$0xff] }
   0xc   :  { %148 = vmatpush.bf16.msra.mxu2 %v792_v12  ;;  %v796_v22 = vld [vmem:[%s1038_s5] sm:$0xff]  ;;  %v804_v52 = vld [vmem:[#allocation2 + $0x58] sm:$0xff]  ;;  %v803_v53 = vld [vmem:[#allocation2 + $0x50] sm:$0xff] }
   0xd   :  { %188 = vmatpush.bf16.msra.mxu3 %v794_v20  ;;  %v825_v38 = vld [vmem:[%s1039_s6] ss:$0 sm:$0xff]  ;;  %v826_v46 = vld [vmem:[%s1035_s2 + $0x1] ss:$0 sm:$0xff]  ;;  %v827_v54 = vld [vmem:[%s1037_s4 + $0x3] ss:$0 sm:$0xff] }
   0xe   :  { %v801_v45 = vld [vmem:[#allocation2 + $0x40] sm:$0xff]  ;;  %v806_v60 = vld [vmem:[%s1038_s5 + $0x18] sm:$0xff]  ;;  %v805_v61 = vld [vmem:[%s1038_s5 + $0x10] sm:$0xff] }
   0xf   :  { %226 = vmatpush.bf16.msrb.mxu0 %v796_v22  ;;  %259 = vmatpush.bf16.msrb.mxu1 %v798_v29  ;;  %v828_v62 = vld [vmem:[%s1037_s4 + $0x4] ss:$0 sm:$0xff]  ;;  %v807_v4 = vld [vmem:[%s1034_s1 + $0x10] sm:$0xff]  ;;  %v809_v11 = vld [vmem:[#allocation2 + $0x68] sm:$0xff] }
  0x10   :  { %298 = vmatpush.bf16.msrb.mxu2 %v800_v36  ;;  %v808_v12 = vld [vmem:[#allocation2 + $0x60] sm:$0xff]  ;;  %v811_v19 = vld [vmem:[#allocation2 + $0x78] sm:$0xff]  ;;  %v810_v20 = vld [vmem:[#allocation2 + $0x70] sm:$0xff] }
  0x11   :  { %338 = vmatpush.bf16.msrb.mxu3 %v802_v44  ;;  %v831_v21 = vld [vmem:[%s1035_s2 + $0x2] ss:$0 sm:$0xff]  ;;  %v832_v29 = vld [vmem:[%s1037_s4 + $0x6] ss:$0 sm:$0xff]  ;;  %v834_v44 = vld [vmem:[%s1037_s4 + $0x8] ss:$0 sm:$0xff] }
  0x12   :  { %v814_v36 = vld [vmem:[%s1038_s5 + $0x20] sm:$0xff] }
  0x13   :  { %378 = vmatpush.bf16.msra.mxu0 %v804_v52 }
  0x14   :  { %299 = vmatpush.bf16.msrb.mxu2 %v799_v37  ;;  %v833_v37 = vld [vmem:[%s1037_s4 + $0x7] ss:$0 sm:$0xff] }
  0x15   :  { %339 = vmatpush.bf16.msrb.mxu3 %v801_v45 }
  0x17   :  { %379 = vmatpush.bf16.msra.mxu0 %v803_v53 }
  0x87   :  { %v71_v6 = vpop.f32.mrf.mxu0 }
  0x88   :  { %v72_v7 = vadd.f32 %v821_v5, %v71_v6  ;;  %v829_v5 = vld [vmem:[%s1037_s4 + $0x5] ss:$0 sm:$0xff]  ;;  %s892_s4 = smov [#allocation5]  }
  0x89   :  { %s630_s29 = sshll.u32 %s892_s4, 4  ;;  %s631_s29 = int_to_ptr.vmem [resolvable:$true] %s630_s29 }
  0x8a   :  { %v75_v8 = vmax.f32 %v72_v7, 0.0 }
  0x8c   :  { %v76_v9 = vpack.c.bf16 %v75_v8, %v75_v8 }
  0x8e   :  { %655 = vmatmul.msk.bf16.vlgmr.msra.gmra.mxu1 %vm97_vm1, %v76_v9 }
  0x8f   :  { %v73_v10 = vpop.f32.mrf.mxu0  ;;  %418 = vmatpush.bf16.msra.mxu1 %v806_v60 }
  0x93   :  { %419 = vmatpush.bf16.msra.mxu1 %v805_v61 }
 0x10b   :  { %v110_v14 = vpop.f32.mrf.mxu1 }
 0x10c   :  { %v111_v15 = vadd.f32 %v822_v13, %v110_v14  ;;  %v830_v13 = vld [vmem:[%s1039_s6 + $0x1] ss:$0 sm:$0xff] }
 0x10e   :  { %v114_v16 = vmax.f32 %v111_v15, 0.0 }
 0x110   :  { %v115_v17 = vpack.c.bf16 %v114_v16, %v114_v16 }
 0x112   :  { %665 = vmatmul.msk.bf16.vlgmr.msra.gmra.mxu2 %vm97_vm1, %v115_v17 }
 0x113   :  { %v112_v18 = vpop.f32.mrf.mxu1  ;;  %452 = vmatpush.bf16.msra.mxu2 %v807_v4 }
 0x195   :  { %v150_v24 = vpop.f32.mrf.mxu2 }
 0x196   :  { %v151_v25 = vadd.f32 %v823_v23, %v150_v24 }
 0x198   :  { %v154_v26 = vmax.f32 %v151_v25, 0.0 }
 0x19a   :  { %v155_v27 = vpack.c.bf16 %v154_v26, %v154_v26 }
 0x19c   :  { %675 = vmatmul.msk.bf16.vlgmr.msra.gmra.mxu3 %vm97_vm1, %v155_v27  ;;  %v813_v27 = vld [vmem:[#allocation2 + $0x88] sm:$0xff] }
 0x19d   :  { %v152_v28 = vpop.f32.mrf.mxu2  ;;  %491 = vmatpush.bf16.msra.mxu3 %v809_v11 }
 0x19e   :  { %v812_v28 = vld [vmem:[#allocation2 + $0x80] sm:$0xff] }
 0x1a1   :  { %492 = vmatpush.bf16.msra.mxu3 %v808_v12 }
 0x21f   :  { %v190_v31 = vpop.f32.mrf.mxu3 }
 0x220   :  { %v191_v32 = vadd.f32 %v824_v30, %v190_v31 }
 0x222   :  { %v194_v33 = vmax.f32 %v191_v32, 0.0 }
 0x224   :  { %v195_v34 = vpack.c.bf16 %v194_v33, %v194_v33 }
 0x226   :  { %684 = vmatmul.msk.bf16.vlgmr.msrb.gmra.mxu0 %vm97_vm1, %v195_v34 }
 0x227   :  { %v192_v35 = vpop.f32.mrf.mxu3  ;;  %531 = vmatpush.bf16.msrb.mxu0 %v811_v19 }
 0x228   :  { %v815_v35 = vld [vmem:[%s1038_s5 + $0x28] sm:$0xff] }
 0x22b   :  { %532 = vmatpush.bf16.msrb.mxu0 %v810_v20 }
 0x2a3   :  { %v228_v39 = vpop.f32.mrf.mxu0 }
 0x2a4   :  { %v971_v40 = vadd.f32 %v825_v38, %v228_v39 }
 0x2a6   :  { %v232_v41 = vsub.f32 %v44_v1, %v971_v40 }
 0x2a8   :  { %v234_v42 = vpack.c.bf16 %v232_v41, %v232_v41 }
 0x2aa   :  { %692 = vmatmul.msk.bf16.vlgmr.msrb.gmra.mxu1 %vm58_vm0, %v234_v42 }
 0x2ab   :  { %v230_v43 = vpop.f32.mrf.mxu0  ;;  %571 = vmatpush.bf16.msrb.mxu1 %v813_v27 }
 0x2af   :  { %572 = vmatpush.bf16.msrb.mxu1 %v812_v28 }
 0x327   :  { %v261_v47 = vpop.f32.mrf.mxu1 }
 0x328   :  { %v262_v48 = vadd.f32 %v826_v46, %v261_v47 }
 0x32a   :  { %v265_v49 = vmax.f32 %v262_v48, 0.0 }
 0x32c   :  { %v266_v50 = vpack.c.bf16 %v265_v49, %v265_v49 }
 0x32e   :  { %702 = vmatmul.msk.bf16.vlgmr.msrb.gmra.mxu2 %vm97_vm1, %v266_v50  ;;  %v835_v50 = vld [vmem:[%s1039_s6 + $0x2] ss:$0 sm:$0xff] }
 0x32f   :  { %v263_v51 = vpop.f32.mrf.mxu1  ;;  %611 = vmatpush.bf16.msrb.mxu2 %v815_v35 }
 0x333   :  { %612 = vmatpush.bf16.msrb.mxu2 %v814_v36 }
 0x3b1   :  { %v301_v55 = vpop.f32.mrf.mxu2 }
 0x3b2   :  { %v302_v56 = vadd.f32 %v827_v54, %v301_v55 }
 0x3b4   :  { %v305_v57 = vmax.f32 %v302_v56, 0.0 }
 0x3b6   :  { %v306_v58 = vpack.c.bf16 %v305_v57, %v305_v57 }
 0x3b8   :  { %712 = vmatmul.msk.bf16.vlgmr.msrb.gmra.mxu3 %vm97_vm1, %v306_v58 }
 0x3b9   :  { %v303_v59 = vpop.f32.mrf.mxu2 }
 0x43b   :  { %v341_v63 = vpop.f32.mrf.mxu3 }
 0x43c   :  { %v342_v0 = vadd.f32 %v828_v62, %v341_v63 }
 0x43e   :  { %v345_v1 = vmax.f32 %v342_v0, 0.0 }
 0x440   :  { %v346_v2 = vpack.c.bf16 %v345_v1, %v345_v1 }
 0x442   :  { %722 = vmatmul.msk.bf16.vlgmr.msra.gmra.mxu0 %vm97_vm1, %v346_v2 }
 0x443   :  { %v343_v3 = vpop.f32.mrf.mxu3 }
 0x4bf   :  { %v381_v6 = vpop.f32.mrf.mxu0 }
 0x4c0   :  { %v382_v7 = vadd.f32 %v829_v5, %v381_v6 }
 0x4c2   :  { %v385_v8 = vmax.f32 %v382_v7, 0.0 }
 0x4c4   :  { %v386_v9 = vpack.c.bf16 %v385_v8, %v385_v8 }
 0x4c6   :  { %736 = vmatmul.msk.bf16.vlgmr.msra.gmra.mxu1 %vm97_vm1, %v386_v9 }
 0x4c7   :  { %v383_v10 = vpop.f32.mrf.mxu0 }
 0x543   :  { %v421_v14 = vpop.f32.mrf.mxu1 }
 0x544   :  { %v422_v15 = vadd.f32 %v830_v13, %v421_v14 }
 0x546   :  { %v425_v16 = vsub.f32 %v232_v41, %v422_v15  ;;  %v426_v52 = vadd.f32 %v422_v15, %v971_v40 }
 0x548   :  { %v427_v17 = vpack.c.bf16 %v425_v16, %v425_v16 }
 0x54a   :  { %744 = vmatmul.msk.bf16.vlgmr.msra.gmra.mxu2 %vm58_vm0, %v427_v17 }
 0x54b   :  { %v423_v18 = vpop.f32.mrf.mxu1 }
 0x5cd   :  { %v454_v22 = vpop.f32.mrf.mxu2 }
 0x5ce   :  { %v455_v23 = vadd.f32 %v831_v21, %v454_v22 }
 0x5d0   :  { %v458_v24 = vmax.f32 %v455_v23, 0.0 }
 0x5d2   :  { %v459_v25 = vpack.c.bf16 %v458_v24, %v458_v24 }
 0x5d4   :  { %754 = vmatmul.msk.bf16.vlgmr.msra.gmra.mxu3 %vm97_vm1, %v459_v25 }
 0x5d5   :  { %v456_v26 = vpop.f32.mrf.mxu2 }
 0x657   :  { %v494_v30 = vpop.f32.mrf.mxu3 }
 0x658   :  { %v495_v31 = vadd.f32 %v832_v29, %v494_v30 }
 0x65a   :  { %v498_v32 = vmax.f32 %v495_v31, 0.0 }
 0x65c   :  { %v499_v33 = vpack.c.bf16 %v498_v32, %v498_v32 }
 0x65e   :  { %764 = vmatmul.msk.bf16.vlgmr.msrb.gmra.mxu0 %vm97_vm1, %v499_v33 }
 0x65f   :  { %v496_v34 = vpop.f32.mrf.mxu3 }
 0x6db   :  { %v534_v38 = vpop.f32.mrf.mxu0 }
 0x6dc   :  { %v535_v39 = vadd.f32 %v833_v37, %v534_v38 }
 0x6de   :  { %v538_v41 = vmax.f32 %v535_v39, 0.0 }
 0x6e0   :  { %v539_v42 = vpack.c.bf16 %v538_v41, %v538_v41 }
 0x6e2   :  { %774 = vmatmul.msk.bf16.vlgmr.msrb.gmra.mxu1 %vm97_vm1, %v539_v42 }
 0x6e3   :  { %v536_v43 = vpop.f32.mrf.mxu0 }
 0x75f   :  { %v574_v45 = vpop.f32.mrf.mxu1 }
 0x760   :  { %v575_v46 = vadd.f32 %v834_v44, %v574_v45 }
 0x762   :  { %v578_v47 = vmax.f32 %v575_v46, 0.0 }
 0x764   :  { %v579_v48 = vpack.c.bf16 %v578_v47, %v578_v47 }
 0x766   :  { %788 = vmatmul.msk.bf16.vlgmr.msrb.gmra.mxu2 %vm97_vm1, %v579_v48 }
 0x767   :  { %v576_v49 = vpop.f32.mrf.mxu1 }
 0x7e9   :  { %v614_v51 = vpop.f32.mrf.mxu2 }
 0x7ea   :  { %v615_v53 = vadd.f32 %v835_v50, %v614_v51 }
 0x7ec   :  { %v618_v54 = vadd.f32 %v615_v53, %v426_v52 }
 0x7ee   :  { %620 = vrot.lane.b32.xlu0 %v618_v54, %s891_s28 }
 0x7f1   :  { %v616_v55 = vpop.f32.mrf.mxu2 }
 0x860   :  { %v621_v56 = vpop.permute.xlu0 %620 }
 0x861   :  { %624 = vst.msk [vmem:[#allocation5] sm:$0xff] %vm623_vm2, %v621_v56 }
 0x862   :  { %635 = dma.vmem_to_hbm [thread:$0]  %s631_s29, 128, %s633_s9, [#allocation4]  }
 0x863   :  { %886 = dma.done.wait [#allocation4], 128  }
 0x864   :  { %887 = vsyncadd [#allocation4], 4294967168 }
 0x865   :  { %640 = vsyncpa [#allocation3], 1 }
 0x866   :  { %641 = vsyncpa [#allocation4], 1 }

</bundles_post_ra>
